<compile_context>
chip_gen: v7x
topology: tpu7x:2x2x1
jax: 0.10.0
libtpu: 0.0.40
codegen_flags: <defaults>
</compile_context>

<pallas_src>
import functools

import jax
import jax.numpy as jnp
import numpy as np
from jax.experimental import pallas as pl
from jax.experimental.pallas import tpu as pltpu


def construct_UUt(n, d):
    """Reference construction of the frozen projection weight (for checking)."""
    U = np.identity(n, dtype=np.float32)[:, 0:d]
    return (U @ U.T).astype(np.float32)  # (n, n) diagonal 0/1 matrix


# ---------------------------------------------------------------------------
# Pallas kernel
# ---------------------------------------------------------------------------
def _proj_scale_kernel(mf_ref, x_ref, o_ref, *, d, block_n):
    """One (block_b, block_n) output tile of  y = mask(<d) * x * multFactor."""
    j = pl.program_id(1)                 # column-tile index
    mf = mf_ref[0]                       # trainable scalar (SMEM)

    n_full = d // block_n                # column tiles fully inside [0, d)
    n_data = -(-d // block_n)            # column tiles intersecting [0, d)

    @pl.when(j >= n_data)                # tile entirely >= d: just zeros
    def _zero():
        o_ref[...] = jnp.zeros_like(o_ref)

    @pl.when(j < n_full)                 # tile entirely < d: plain scale
    def _full():
        o_ref[...] = x_ref[...].astype(jnp.float32) * mf

    if n_data > n_full:                  # exactly one straddling tile exists
        rem = d - n_full * block_n       # static, 0 < rem < block_n

        @pl.when(j == n_full)
        def _boundary():
            col = jax.lax.broadcasted_iota(jnp.int32, o_ref.shape, 1)
            scaled = x_ref[...].astype(jnp.float32) * mf
            o_ref[...] = jnp.where(col < rem, scaled, jnp.float32(0.0))


# ---------------------------------------------------------------------------
# Tiling helpers
# ---------------------------------------------------------------------------
def _largest_tile(total, unit, cap):
    """Largest multiple of `unit` that divides `total` and is <= cap.

    Precondition: total % unit == 0.
    """
    cap = max(unit, min(cap, total))
    t = cap - (cap % unit)
    while t > unit:
        if total % t == 0:
            return t
        t -= unit
    return unit


# ---------------------------------------------------------------------------
# Wrapper (forward of the default-branch NeuralNetwork)
# ---------------------------------------------------------------------------
def subspace_projection_forward(x, d, mult_factor, *, use_pallas=None):
    """y = (x.float() @ (U U^T).T) * multFactor  with U = I[:, :d]."""
    B, N = x.shape
    assert 0 <= d <= N

    if use_pallas is None:
        # Below ~1 MiB the pallas_call launch/DMA-setup overhead dominates;
        # let XLA fuse the trivial elementwise with its neighbours instead.
        use_pallas = (B % 8 == 0) and (N % 128 == 0) and (B * N * 4 >= (1 << 20))

    if (not use_pallas) or (B % 8 != 0) or (N % 128 != 0):
        xf = x.astype(jnp.float32)
        mf = jnp.asarray(mult_factor, jnp.float32)
        col = jnp.arange(N)
        return jnp.where(col < d, xf * mf, jnp.float32(0.0))

    # ---- tile sizes from a conservative VMEM budget (safe on v5e/v6e/v7x) ----
    in_itemsize = jnp.dtype(x.dtype).itemsize
    block_n = _largest_tile(N, 128, 1024)                 # lane-dense output
    vmem_budget = 10 * 1024 * 1024                        # live double-buffered
    per_row = block_n * (2 * in_itemsize + 2 * 4)         # 2x in + 2x out bufs
    block_b = _largest_tile(B, 8, min(1024, max(8, vmem_budget // per_row)))

    # Make sure there are >= 2 grid steps so both v7x TensorCores get work.
    if (B // block_b) * (N // block_n) < 2:
        if N // 128 >= 2:
            block_n = _largest_tile(N, 128, max(128, block_n // 2))
        elif B // 8 >= 2:
            block_b = _largest_tile(B, 8, max(8, block_b // 2))

    nb, nn = B // block_b, N // block_n

    # Input column-block index is clamped to the last tile containing data,
    # so fully-zero output tiles never trigger a fresh HBM read of x
    # (Pallas skips the DMA when the block index does not change).
    n_data = -(-d // block_n)
    j_clamp = max(n_data - 1, 0)

    mf = jnp.asarray(mult_factor, dtype=jnp.float32).reshape((1,))
    kernel = functools.partial(_proj_scale_kernel, d=d, block_n=block_n)

    return pl.pallas_call(
        kernel,
        out_shape=jax.ShapeDtypeStruct((B, N), jnp.float32),
        grid=(nb, nn),
        in_specs=[
            pl.BlockSpec(memory_space=pltpu.SMEM),                        # multFactor
            pl.BlockSpec((block_b, block_n),
                         lambda i, j: (i, jnp.minimum(j, j_clamp))),      # x (clamped)
        ],
        out_specs=pl.BlockSpec((block_b, block_n), lambda i, j: (i, j)),
        compiler_params=pltpu.CompilerParams(
            dimension_semantics=("parallel", "parallel"),
            vmem_limit_bytes=32 * 1024 * 1024,
        ),
    )(mf, x)


# TODO(synk): the other __init__ branches (full_linear learned dense matmul,
# skip_linear mask, not_skip_linear_diagonal) are not exercised by the
# default-constructed module and are not implemented here.


if __name__ == "__main__":
    key = jax.random.PRNGKey(0)
    mult_factor = 0.5  # module default: multFactor = 0.5

    # Case 1: tiny module-default shapes (batch=8, n=128, d=32) -> fused XLA path.
    B1, N1, D1 = 8, 128, 32
    k1, k2 = jax.random.split(key)
    x1 = jax.random.normal(k1, (B1, N1), dtype=jnp.float32)
    y1 = subspace_projection_forward(x1, D1, mult_factor)

    # Case 2: force the Pallas kernel (bf16 input, d not a multiple of 128,
    # exercises in-kernel cast, boundary-tile mask, and zero tiles).
    B2, N2, D2 = 64, 512, 96
    x2 = jax.random.normal(k2, (B2, N2), dtype=jnp.float32).astype(jnp.bfloat16)
    y2 = subspace_projection_forward(x2, D2, mult_factor, use_pallas=True)

    jax.block_until_ready((y1, y2))

    # Reference check against the dense frozen weight (pure JAX).
    for x, d, y in ((x1, D1, y1), (x2, D2, y2)):
        w = jnp.asarray(construct_UUt(x.shape[1], d))
        y_ref = (x.astype(jnp.float32) @ w.T) * jnp.float32(mult_factor)
        np.testing.assert_allclose(np.asarray(y), np.asarray(y_ref),
                                   rtol=1e-6, atol=1e-6)

    print("KERNEL_OK")
</pallas_src>

<mosaic_0001>
module attributes {stable_mosaic.version = 11 : i64} {
  func.func @_proj_scale_kernel(%arg0: i32, %arg1: i32, %arg2: memref<1xf32, #tpu.memory_space<smem>>, %arg3: memref<64x256xbf16, #tpu.memory_space<vmem>>, %arg4: memref<64x256xf32, #tpu.memory_space<vmem>>) attributes {dimension_semantics = [#tpu.dimension_semantics<parallel>, #tpu.dimension_semantics<parallel>], iteration_bounds = array<i64: 1, 2>, scalar_prefetch = 0 : i64, scratch_operands = 0 : i64, tpu.core_type = #tpu.core_type<tc>, window_params = [{transform_indices = @transform_0, window_bounds = array<i64: 1>}, {transform_indices = @transform_1, window_bounds = array<i64: 64, 256>}, {transform_indices = @transform_2, window_bounds = array<i64: 64, 256>}]} {
    %c0 = arith.constant 0 : index
    %0 = memref.load %arg2[%c0] : memref<1xf32, #tpu.memory_space<smem>>
    %c1_i32 = arith.constant 1 : i32
    %1 = arith.cmpi sge, %arg1, %c1_i32 : i32
    %2 = arith.extui %1 : i1 to i32
    %c0_i32 = arith.constant 0 : i32
    %3 = arith.cmpi ne, %2, %c0_i32 : i32
    scf.if %3 {
      %cst = arith.constant 0.000000e+00 : f32
      %10 = vector.broadcast %cst : f32 to vector<64x256xf32>
      %c0_4 = arith.constant 0 : index
      %c0_5 = arith.constant 0 : index
      %11 = vector.load %arg4[%c0_4, %c0_5] : memref<64x256xf32, #tpu.memory_space<vmem>>, vector<64x256xf32>
      tpu.vector_store %arg4[%c0_4, %c0_5], %10 {strides = array<i32>} : memref<64x256xf32, #tpu.memory_space<vmem>>, vector<64x256xf32>,
    } else {
    }
    %c0_i32_0 = arith.constant 0 : i32
    %4 = arith.cmpi slt, %arg1, %c0_i32_0 : i32
    %5 = arith.extui %4 : i1 to i32
    %c0_i32_1 = arith.constant 0 : i32
    %6 = arith.cmpi ne, %5, %c0_i32_1 : i32
    scf.if %6 {
      %c0_4 = arith.constant 0 : index
      %c0_5 = arith.constant 0 : index
      %10 = vector.load %arg3[%c0_4, %c0_5] : memref<64x256xbf16, #tpu.memory_space<vmem>>, vector<64x256xbf16>
      %11 = arith.extf %10 : vector<64x256xbf16> to vector<64x256xf32>
      %12 = vector.broadcast %0 : f32 to vector<64x256xf32>
      %13 = arith.mulf %11, %12 : vector<64x256xf32>
      %c0_6 = arith.constant 0 : index
      %c0_7 = arith.constant 0 : index
      %14 = vector.load %arg4[%c0_6, %c0_7] : memref<64x256xf32, #tpu.memory_space<vmem>>, vector<64x256xf32>
      tpu.vector_store %arg4[%c0_6, %c0_7], %13 {strides = array<i32>} : memref<64x256xf32, #tpu.memory_space<vmem>>, vector<64x256xf32>,
    } else {
    }
    %c0_i32_2 = arith.constant 0 : i32
    %7 = arith.cmpi eq, %arg1, %c0_i32_2 : i32
    %8 = arith.extui %7 : i1 to i32
    %c0_i32_3 = arith.constant 0 : i32
    %9 = arith.cmpi ne, %8, %c0_i32_3 : i32
    scf.if %9 {
      %10 = tpu.iota {dimensions = array<i32: 1>} : vector<64x256xi32>
      %c0_4 = arith.constant 0 : index
      %c0_5 = arith.constant 0 : index
      %11 = vector.load %arg3[%c0_4, %c0_5] : memref<64x256xbf16, #tpu.memory_space<vmem>>, vector<64x256xbf16>
      %12 = arith.extf %11 : vector<64x256xbf16> to vector<64x256xf32>
      %13 = vector.broadcast %0 : f32 to vector<64x256xf32>
      %14 = arith.mulf %12, %13 : vector<64x256xf32>
      %c96_i32 = arith.constant 96 : i32
      %15 = vector.broadcast %c96_i32 : i32 to vector<64x256xi32>
      %16 = arith.cmpi slt, %10, %15 : vector<64x256xi32>
      %cst = arith.constant 0.000000e+00 : f32
      %17 = vector.broadcast %cst : f32 to vector<64x256xf32>
      %18 = arith.select %16, %14, %17 : vector<64x256xi1>, vector<64x256xf32>
      %c0_6 = arith.constant 0 : index
      %c0_7 = arith.constant 0 : index
      %19 = vector.load %arg4[%c0_6, %c0_7] : memref<64x256xf32, #tpu.memory_space<vmem>>, vector<64x256xf32>
      tpu.vector_store %arg4[%c0_6, %c0_7], %18 {strides = array<i32>} : memref<64x256xf32, #tpu.memory_space<vmem>>, vector<64x256xf32>,
    } else {
    }
    return
  }
  func.func @transform_0(%arg0: i32, %arg1: i32) -> i32 {
    %c0_i32 = arith.constant 0 : i32
    %c0_i32_0 = arith.constant 0 : i32
    return %c0_i32 : i32
  }
  func.func @transform_1(%arg0: i32, %arg1: i32) -> (i32, i32) {
    %c0_i32 = arith.constant 0 : i32
    %0 = arith.minsi %arg1, %c0_i32 : i32
    %c0_i32_0 = arith.constant 0 : i32
    return %arg0, %0 : i32, i32
  }
  func.func @transform_2(%arg0: i32, %arg1: i32) -> (i32, i32) {
    %c0_i32 = arith.constant 0 : i32
    return %arg0, %arg1 : i32, i32
  }
}

</mosaic_0001>

<bundles_post_ra>
// kernel: tpu_custom_call.1
= control target key start
LH: loop header
LB: loop body
LE: loop exit
PB: predicated region body
PF: predicated region fallthrough
CT: control target
= control target key end

     0   :  { %s1000_s0 = inlined_call_operand.<no memory space> [shape: f32[1], index: 0, kind: input, shape index: {}]   ;;  %s1001_s1 = inlined_call_operand.hbm [shape: bf16[64,512], index: 1, kind: input, shape index: {}]   ;;  %s1002_s2 = inlined_call_operand.hbm [shape: f32[64,512], index: 2, kind: output, shape index: {}]  }
   0x1   :  { %7 = sst [smem:[#allocation2]] %s1000_s0 }
   0x2   :  { %8 = vsyncpa [#allocation4], 0 }
   0x3   :  { %10 = vsyncpa [#allocation4 + $0x1], 0 }
   0x4   :  { %11 = vsyncpa [#allocation5], 0 }
   0x5   :  { %13 = vsyncpa [#allocation5 + $0x1], 0  ;;  %s739_s11 = smov 0   ;;  %s741_s12 = smov 0  }
   0x6   :  { %s743_s13 = smov 0   ;;  %s745_s14 = smov 0  }
   0x7   :  { %s747_s15 = smov 0   ;;  %s749_s16 = smov 0  }
   0x8   :  { %s751_s17 = smov 0   ;;  %s753_s18 = smov 0  }
   0x9 LB: > { %s462_s0 = sadd.s32 4294967295, %s709_s18   ;;  %s463_s19 = sadd.s32 4294967294, %s709_s18   ;;  %s709_s18 = sphi %s753_s18, %s19_s18   ;;  %s705_s17 = sphi %s751_s17, %s1020_s17   ;;  %s701_s16 = sphi %s749_s16, %s1019_s16   ;;  %s697_s15 = sphi %s747_s15, %s990_s15   ;;  %s693_s14 = sphi %s745_s14, %s1018_s14   ;;  %s689_s13 = sphi %s743_s13, %s1017_s13   ;;  %s685_s12 = sphi %s741_s12, %s1016_s12   ;;  %s681_s11 = sphi %s739_s11, %s1015_s11  }
   0xa   : > { %s28_s20 = sadd.s32 1, %s705_s17  ;;  %p678_p1 = scmp.ne.s32.totalorder %s697_s15, 0 }
   0xb   : > { %p29_p0 = scmp.ge.s32.totalorder %s28_s20, 2  ;;  %p73_p2 = scmp.eq.s32.totalorder %s709_s18, 0 }
   0xc   : > { %p78_p3 = scmp.ne.s32.totalorder %s697_s15, %s693_s14  ;;  %p79_p5 = scmp.eq.s32.totalorder %s462_s0, 0 }
   0xd   : > { %s1022_s20 = smov (%p29_p0, %s28_s20), 0  ;;  %p785_p4 = por %p678_p1, %p73_p2 }
   0xe   : > { %p789_p6 = por %p79_p5, %p78_p3  ;;  %s89_s23 = ssub.s32 %s705_s17, %s1022_s20 }
   0xf   : > { %p91_p7 = scmp.eq.s32.totalorder %s89_s23, 0  ;;  %s93_s24 = sadd.s32 1, %s689_s13 }
  0x10   : > { %s1006_s22 = scalar_select %p789_p6, 1, 0 }
  0x11   : > { %s797_s25 = scalar_select %p91_p7, %s689_s13, %s93_s24  }
  0x12   : > { %p103_p8 = scmp.ne.s32.totalorder %s689_s13, %s685_s12  ;;  %p104_p9 = scmp.eq.s32.totalorder %s462_s0, 1 }
  0x13   : > { %p109_p10 = scmp.ne.s32.totalorder %s685_s12, %s681_s11  ;;  %p110_p11 = scmp.eq.s32.totalorder %s463_s19, 1 }
  0x14   : > { %p803_p12 = por %p104_p9, %p103_p8  ;;  %p494_p1 = scmp.lt.s32.totalorder %s709_s18, 2 }
  0x15   : > { %p808_p0 = por %p110_p11, %p109_p10  ;;  %s711_s28 = smov [#allocation3]  }
  0x16   : > { %s1007_s26 = scalar_select %p803_p12, 1, 0 }
  0x17   : > { %s1008_s27 = scalar_select %p808_p0, 1, 0 }
  0x18   : > { %s149_s29 = sshll.u32 %s711_s28, 4  ;;  %p815_p2 = pnand %p494_p1, %p785_p4  ;;  %s819_s29 = int_to_ptr.vmem [resolvable:$true] %s149_s29 }
  0x19   : > { %s576_s5 = scalar_lea.hbm %s1001_s1, 1024  ;;  %s581_s10 = scalar_lea.hbm %s1001_s1, 2048 }
  0x1a   : > { %p577_p5 = scmp.ne.s32.totalorder %s1001_s1, %s576_s5  ;;  %p578_p7 = pneg %p815_p2 }
  0x1b   : > { %p583_p4 = scmp.lt.u32.totalorder %s581_s10, %s576_s5  ;;  %p585_p10 = scmp.lt.u32.totalorder %s576_s5, %s1001_s1 }
  0x1c   : > { %p579_p8 = pnand %p578_p7, %p577_p5 }
  0x1d   : > { %p586_p11 = por %p585_p10, %p583_p4 }
  0x1e   : > { %p580_p9 = pneg %p579_p8 }
  0x20   : > { %p587_p1 = pnand %p586_p11, %p580_p9 }
  0x22   : > { %590 = shalt.err (!%p587_p1)
}
  0x23   : > { %s591_s19 = scalar_lea.vmem %s819_s29, 1024  ;;  %s598_s21 = scalar_lea.vmem %s819_s29, 2048 }
  0x24   : > { %p592_p13 = scmp.ne.s32.totalorder %s819_s29, %s591_s19  ;;  %p599_p3 = scmp.lt.s32.totalorder %s819_s29, %s819_s29 }
  0x25   : > { %p600_p0 = scmp.lt.s32.totalorder %s598_s21, %s591_s19 }
  0x26   : > { %p594_p5 = pnand %p592_p13, %p578_p7 }
  0x27   : > { %p601_p12 = por %p600_p0, %p599_p3 }
  0x28   : > { %p595_p8 = pneg %p594_p5 }
  0x2a   : > { %p602_p6 = pnand %p601_p12, %p595_p8 }
  0x2c   : > { %605 = shalt.err (!%p602_p6)
}
  0x2d   : > { %s712_s23 = smov 256   ;;  %s713_s24 = smov 128  }
  0x2e   : > { %s714_s28 = smov 8   ;;  %p157_p13 = scmp.lt.s32.totalorder %s709_s18, 3 }
  0x2f   : > { %489 = dma.hbm_to_vmem [thread:$0]  (!%p815_p2), %s1001_s1, 1024, %s819_s29, [#allocation4], %s712_s23, %s713_s24, %s714_s28  }
  0x30   : > { %p1010_p7 = scmp.ge.s32.totalorder %s709_s18, 1 }
  0x32   : > { %p158_p9 = pnand %p1010_p7, %p157_p13 }
  0x33   : > { %s163_s5 = sand.u32 (!%p158_p9), 1, %s697_s15   ;;  %p1011_p6 = scmp.ne.s32.totalorder (!%p158_p9), %s1006_s22, 0 }
  0x34   : > { %161 = sbr.rel (%p158_p9) target bundleno = 125 (0x7d), region = 28  ;;  %s470_s6 = sshll.u32 (!%p158_p9), %s163_s5, 6 }
  0x35   : > { %s164_s7 = scalar_lea.sflag (!%p158_p9), [#allocation4], %s163_s5  ;;  %s851_s8 = scalar_lea.vmem (!%p158_p9), [#allocation3], %s470_s6 }
  0x3b   : > { %671 = dma.done.wait (%p1011_p6), %s164_s7, 1024  }
  0x3c   : > { %673 = vsyncadd (%p1011_p6), %s164_s7, 4294966272  ;;  %s185_s30 = sand.u32 1, %s685_s12   ;;  %s858_s29 = sld [smem:[#allocation2]] }
  0x3d   : > { %s471_s9 = sshll.u32 %s185_s30, 7  ;;  %p472_p12 = scmp.lt.s32.totalorder %s701_s16, 1 }
  0x3e   : > { %s862_s10 = scalar_lea.vmem [#allocation6], %s471_s9  ;;  %v715_v0 = vmov (!%p472_p12), 0.0  }
  0x3f   : > { %198 = sbr.rel (%p472_p12) target bundleno = 71 (0x47), region = 36  ;;  %199 = vst [vmem:[%s862_s10] sm:$0xff] (!%p472_p12), %v715_v0  ;;  %200 = vst [vmem:[%s862_s10 + $0x8] sm:$0xff] (!%p472_p12), %v715_v0 }
  0x40   : > { %201 = vst [vmem:[%s862_s10 + $0x10] sm:$0xff] (!%p472_p12), %v715_v0  ;;  %202 = vst [vmem:[%s862_s10 + $0x18] sm:$0xff] (!%p472_p12), %v715_v0 }
  0x41   : > { %203 = vst [vmem:[%s862_s10 + $0x20] sm:$0xff] (!%p472_p12), %v715_v0  ;;  %204 = vst [vmem:[%s862_s10 + $0x28] sm:$0xff] (!%p472_p12), %v715_v0 }
  0x42   : > { %205 = vst [vmem:[%s862_s10 + $0x30] sm:$0xff] (!%p472_p12), %v715_v0  ;;  %206 = vst [vmem:[%s862_s10 + $0x38] sm:$0xff] (!%p472_p12), %v715_v0 }
  0x43   : > { %207 = vst [vmem:[%s862_s10 + $0x40] sm:$0xff] (!%p472_p12), %v715_v0  ;;  %208 = vst [vmem:[%s862_s10 + $0x48] sm:$0xff] (!%p472_p12), %v715_v0 }
  0x44   : > { %209 = vst [vmem:[%s862_s10 + $0x50] sm:$0xff] (!%p472_p12), %v715_v0  ;;  %210 = vst [vmem:[%s862_s10 + $0x58] sm:$0xff] (!%p472_p12), %v715_v0 }
  0x45   : > { %211 = vst [vmem:[%s862_s10 + $0x60] sm:$0xff] (!%p472_p12), %v715_v0  ;;  %212 = vst [vmem:[%s862_s10 + $0x68] sm:$0xff] (!%p472_p12), %v715_v0 }
  0x46   : > { %213 = vst [vmem:[%s862_s10 + $0x70] sm:$0xff] %v715_v0  ;;  %214 = vst [vmem:[%s862_s10 + $0x78] sm:$0xff] %v715_v0 }
  0x47 PF: > { %p473_p0 = scmp.ge.s32.totalorder %s701_s16, 0 }
  0x48   : > { %v219_v1 = vld [vmem:[%s851_s8] sm:$0xff] (!%p473_p0)  ;;  %v243_v2 = vstv (!%p473_p0), %s858_s29  ;;  %v220_v3 = vld [vmem:[%s851_s8 + $0x8] sm:$0xff] (!%p473_p0)  ;;  %v221_v4 = vld [vmem:[%s851_s8 + $0x10] sm:$0xff] (!%p473_p0) }
  0x49   : > { %218 = sbr.rel (%p473_p0) target bundleno = 85 (0x55), region = 40  ;;  %v227_v5 = vunpack.c.l.bf16 (!%p473_p0), %v219_v1  ;;  %v228_v6 = vunpack.c.h.bf16 (!%p473_p0), %v219_v1  ;;  %v229_v7 = vunpack.c.l.bf16 (!%p473_p0), %v220_v3  ;;  %v230_v8 = vunpack.c.h.bf16 (!%p473_p0), %v220_v3  ;;  %v222_v9 = vld [vmem:[%s851_s8 + $0x18] sm:$0xff] (!%p473_p0)  ;;  %v223_v14 = vld [vmem:[%s851_s8 + $0x20] sm:$0xff] (!%p473_p0)  ;;  %v224_v15 = vld [vmem:[%s851_s8 + $0x28] sm:$0xff] (!%p473_p0) }
  0x4a   : > { %v231_v10 = vunpack.c.l.bf16 (!%p473_p0), %v221_v4  ;;  %v232_v11 = vunpack.c.h.bf16 (!%p473_p0), %v221_v4  ;;  %v233_v12 = vunpack.c.l.bf16 (!%p473_p0), %v222_v9  ;;  %v234_v13 = vunpack.c.h.bf16 (!%p473_p0), %v222_v9  ;;  %v225_v20 = vld [vmem:[%s851_s8 + $0x30] sm:$0xff] (!%p473_p0)  ;;  %v226_v21 = vld [vmem:[%s851_s8 + $0x38] sm:$0xff] (!%p473_p0) }
  0x4b   : > { %v244_v16 = vmul.f32 (!%p473_p0), %v243_v2, %v227_v5  ;;  %v245_v17 = vmul.f32 (!%p473_p0), %v243_v2, %v228_v6  ;;  %v246_v18 = vmul.f32 (!%p473_p0), %v243_v2, %v229_v7  ;;  %v247_v19 = vmul.f32 (!%p473_p0), %v243_v2, %v230_v8 }
  0x4c   : > { %v248_v22 = vmul.f32 (!%p473_p0), %v243_v2, %v231_v10  ;;  %v249_v23 = vmul.f32 (!%p473_p0), %v243_v2, %v232_v11  ;;  %v250_v24 = vmul.f32 (!%p473_p0), %v243_v2, %v233_v12  ;;  %v251_v25 = vmul.f32 (!%p473_p0), %v243_v2, %v234_v13 }
  0x4d   : > { %260 = vst [vmem:[%s862_s10] sm:$0xff] (!%p473_p0), %v244_v16  ;;  %261 = vst [vmem:[%s862_s10 + $0x8] sm:$0xff] (!%p473_p0), %v245_v17  ;;  %v235_v26 = vunpack.c.l.bf16 (!%p473_p0), %v223_v14  ;;  %v236_v27 = vunpack.c.h.bf16 (!%p473_p0), %v223_v14  ;;  %v237_v28 = vunpack.c.l.bf16 (!%p473_p0), %v224_v15  ;;  %v238_v29 = vunpack.c.h.bf16 (!%p473_p0), %v224_v15 }
  0x4e   : > { %262 = vst [vmem:[%s862_s10 + $0x10] sm:$0xff] (!%p473_p0), %v246_v18  ;;  %263 = vst [vmem:[%s862_s10 + $0x18] sm:$0xff] (!%p473_p0), %v247_v19  ;;  %v239_v30 = vunpack.c.l.bf16 (!%p473_p0), %v225_v20  ;;  %v240_v31 = vunpack.c.h.bf16 (!%p473_p0), %v225_v20  ;;  %v241_v32 = vunpack.c.l.bf16 (!%p473_p0), %v226_v21  ;;  %v242_v33 = vunpack.c.h.bf16 (!%p473_p0), %v226_v21 }
  0x4f   : > { %264 = vst [vmem:[%s862_s10 + $0x20] sm:$0xff] (!%p473_p0), %v248_v22  ;;  %265 = vst [vmem:[%s862_s10 + $0x28] sm:$0xff] (!%p473_p0), %v249_v23  ;;  %v252_v34 = vmul.f32 (!%p473_p0), %v243_v2, %v235_v26  ;;  %v253_v35 = vmul.f32 (!%p473_p0), %v243_v2, %v236_v27  ;;  %v254_v36 = vmul.f32 (!%p473_p0), %v243_v2, %v237_v28 }
  0x50   : > { %266 = vst [vmem:[%s862_s10 + $0x30] sm:$0xff] %v250_v24  ;;  %267 = vst [vmem:[%s862_s10 + $0x38] sm:$0xff] %v251_v25  ;;  %v255_v37 = vmul.f32 %v243_v2, %v238_v29  ;;  %v256_v38 = vmul.f32 %v243_v2, %v239_v30  ;;  %v257_v39 = vmul.f32 %v243_v2, %v240_v31 }
  0x51   : > { %v258_v40 = vmul.f32 %v243_v2, %v241_v32  ;;  %v259_v41 = vmul.f32 %v243_v2, %v242_v33  ;;  %268 = vst [vmem:[%s862_s10 + $0x40] sm:$0xff] %v252_v34  ;;  %269 = vst [vmem:[%s862_s10 + $0x48] sm:$0xff] %v253_v35 }
  0x52   : > { %270 = vst [vmem:[%s862_s10 + $0x50] sm:$0xff] %v254_v36  ;;  %271 = vst [vmem:[%s862_s10 + $0x58] sm:$0xff] %v255_v37 }
  0x53   : > { %272 = vst [vmem:[%s862_s10 + $0x60] sm:$0xff] %v256_v38  ;;  %273 = vst [vmem:[%s862_s10 + $0x68] sm:$0xff] %v257_v39 }
  0x54   : > { %274 = vst [vmem:[%s862_s10 + $0x70] sm:$0xff] %v258_v40  ;;  %275 = vst [vmem:[%s862_s10 + $0x78] sm:$0xff] %v259_v41 }
  0x55 PF: > { %p474_p2 = scmp.ne.s32.totalorder %s701_s16, 0 }
  0x56   : > { %v280_v42 = vlaneseq (!%p474_p2)  ;;  %v283_v43 = vld [vmem:[%s851_s8] ss:$8 sps:$4 sm:$0xff] (!%p474_p2)   ;;  %v307_v44 = vstv (!%p474_p2), %s858_s29  ;;  %v285_v45 = vld [vmem:[%s851_s8 + $0x10] ss:$8 sps:$4 sm:$0xff] (!%p474_p2)   ;;  %v716_v47 = vmov (!%p474_p2), 0.0  }
  0x57   : > { %279 = sbr.rel (%p474_p2) target bundleno = 98 (0x62), region = 44  ;;  %v291_v46 = vunpack.c.l.bf16 (!%p474_p2), %v283_v43  ;;  %343 = vst [vmem:[%s862_s10 + $0x8] sm:$0xff] (!%p474_p2), %v716_v47  ;;  %345 = vst [vmem:[%s862_s10 + $0x18] sm:$0xff] (!%p474_p2), %v716_v47  ;;  %v293_v48 = vunpack.c.h.bf16 (!%p474_p2), %v283_v43  ;;  %v295_v49 = vunpack.c.l.bf16 (!%p474_p2), %v285_v45  ;;  %v297_v50 = vunpack.c.h.bf16 (!%p474_p2), %v285_v45  ;;  %v287_v51 = vld [vmem:[%s851_s8 + $0x20] ss:$8 sps:$4 sm:$0xff] (!%p474_p2)  }
  0x58   : > { %347 = vst [vmem:[%s862_s10 + $0x28] sm:$0xff] (!%p474_p2), %v716_v47  ;;  %349 = vst [vmem:[%s862_s10 + $0x38] sm:$0xff] (!%p474_p2), %v716_v47  ;;  %v289_v52 = vld [vmem:[%s851_s8 + $0x30] ss:$8 sps:$4 sm:$0xff] (!%p474_p2)   ;;  %v281_v53 = vand.u32 (!%p474_p2), 127, %v280_v42  ;;  %v299_v54 = vunpack.c.l.bf16 (!%p474_p2), %v287_v51  ;;  %v301_v55 = vunpack.c.h.bf16 (!%p474_p2), %v287_v51 }
  0x59   : > { %351 = vst [vmem:[%s862_s10 + $0x48] sm:$0xff] (!%p474_p2), %v716_v47  ;;  %353 = vst [vmem:[%s862_s10 + $0x58] sm:$0xff] (!%p474_p2), %v716_v47  ;;  %v303_v56 = vunpack.c.l.bf16 (!%p474_p2), %v289_v52  ;;  %v308_v57 = vmul.f32 (!%p474_p2), %v307_v44, %v291_v46  ;;  %v310_v58 = vmul.f32 (!%p474_p2), %v307_v44, %v293_v48  ;;  %v312_v59 = vmul.f32 (!%p474_p2), %v307_v44, %v295_v49 }
  0x5a   : > { %355 = vst [vmem:[%s862_s10 + $0x68] sm:$0xff] (!%p474_p2), %v716_v47  ;;  %357 = vst [vmem:[%s862_s10 + $0x78] sm:$0xff] (!%p474_p2), %v716_v47  ;;  %v314_v60 = vmul.f32 (!%p474_p2), %v307_v44, %v297_v50  ;;  %vm324_vm0 = vcmp.lt.s32.totalorder (!%p474_p2), %v281_v53, 96  ;;  %v316_v61 = vmul.f32 (!%p474_p2), %v307_v44, %v299_v54  ;;  %v318_v62 = vmul.f32 (!%p474_p2), %v307_v44, %v301_v55 }
  0x5b   : > { %v320_v63 = vmul.f32 (!%p474_p2), %v307_v44, %v303_v56  ;;  %v326_v0 = vsel (!%p474_p2), %vm324_vm0, %v308_v57, 0.0  ;;  %v328_v1 = vsel (!%p474_p2), %vm324_vm0, %v310_v58, 0.0  ;;  %v330_v2 = vsel (!%p474_p2), %vm324_vm0, %v312_v59, 0.0 }
  0x5c   : > { %v332_v3 = vsel (!%p474_p2), %vm324_vm0, %v314_v60, 0.0  ;;  %342 = vst [vmem:[%s862_s10] sm:$0xff] (!%p474_p2), %v326_v0  ;;  %344 = vst [vmem:[%s862_s10 + $0x10] sm:$0xff] (!%p474_p2), %v328_v1  ;;  %v334_v4 = vsel (!%p474_p2), %vm324_vm0, %v316_v61, 0.0  ;;  %v336_v5 = vsel (!%p474_p2), %vm324_vm0, %v318_v62, 0.0  ;;  %v305_v7 = vunpack.c.h.bf16 (!%p474_p2), %v289_v52 }
  0x5d   : > { %346 = vst [vmem:[%s862_s10 + $0x20] sm:$0xff] (!%p474_p2), %v330_v2  ;;  %348 = vst [vmem:[%s862_s10 + $0x30] sm:$0xff] (!%p474_p2), %v332_v3  ;;  %v338_v6 = vsel (!%p474_p2), %vm324_vm0, %v320_v63, 0.0 }
  0x5e   : > { %350 = vst [vmem:[%s862_s10 + $0x40] sm:$0xff] %v334_v4  ;;  %352 = vst [vmem:[%s862_s10 + $0x50] sm:$0xff] %v336_v5  ;;  %v322_v8 = vmul.f32 %v307_v44, %v305_v7 }
  0x5f   : > { %354 = vst [vmem:[%s862_s10 + $0x60] sm:$0xff] %v338_v6 }
  0x60   : > { %v340_v9 = vsel %vm324_vm0, %v322_v8, 0.0 }
  0x61   : > { %356 = vst [vmem:[%s862_s10 + $0x70] sm:$0xff] %v340_v9 }
  0x62 PF: > { %s481_s22 = sshll.u32 %s701_s16, 8  ;;  %s375_s21 = sshll.u32 %s862_s10, 4  ;;  %s944_s21 = int_to_ptr.vmem [resolvable:$true] %s375_s21 }
  0x63   : > { %s941_s19 = scalar_lea.hbm %s1002_s2, %s481_s22  ;;  %s948_s23 = scalar_lea.sflag [#allocation5], %s185_s30 }
  0x64   : > { %s606_s24 = scalar_lea.vmem %s944_s21, 2048  ;;  %p1012_p4 = scmp.ne.s32.totalorder %s1007_s26, 0 }
  0x65   : > { %p607_p3 = scmp.ne.s32.totalorder %s944_s21, %s606_s24  ;;  %s717_s16 = smov [#allocation6]  }
  0x66   : > { %s610_s28 = sshll.u32 %s717_s16, 4  ;;  %s611_s28 = int_to_ptr.vmem [resolvable:$false] %s610_s28 }
  0x67   : > { %p608_p10 = pnand %p607_p3, %p1012_p4  ;;  %s612_s3 = scalar_lea.vmem %s611_s28, 4096 }
  0x68   : > { %p613_p1 = scmp.lt.s32.totalorder %s944_s21, %s611_s28  ;;  %p614_p5 = scmp.lt.s32.totalorder %s612_s3, %s606_s24 }
  0x69   : > { %p609_p11 = pneg %p608_p10 }
  0x6a   : > { %p615_p8 = por %p614_p5, %p613_p1 }
  0x6c   : > { %p616_p13 = pnand %p615_p8, %p609_p11 }
  0x6e   : > { %619 = shalt.err (!%p616_p13)
}
  0x6f   : > { %s620_s4 = scalar_lea.hbm %s941_s19, 2048  ;;  %s624_s7 = scalar_lea.hbm %s1002_s2, 4096 }
  0x70   : > { %p621_p7 = scmp.ne.s32.totalorder %s941_s19, %s620_s4  ;;  %p625_p12 = scmp.lt.u32.totalorder %s941_s19, %s1002_s2 }
  0x71   : > { %p626_p0 = scmp.lt.u32.totalorder %s624_s7, %s620_s4  ;;  %p628_p3 = scmp.lt.u32.totalorder %s620_s4, %s941_s19 }
  0x72   : > { %p622_p9 = pnand %p621_p7, %p1012_p4 }
  0x73   : > { %p627_p2 = por %p626_p0, %p625_p12 }
  0x74   : > { %p623_p6 = pneg %p622_p9 }
  0x75   : > { %p629_p10 = por %p628_p3, %p627_p2 }
  0x77   : > { %p630_p11 = pnand %p629_p10, %p623_p6 }
  0x79   : > { %633 = shalt.err (!%p630_p11)
}
  0x7a   : > { %s718_s29 = smov 256   ;;  %s719_s9 = smov 512  }
  0x7b   : > { %s720_s10 = smov 16  }
  0x7c   : > { %484 = dma.vmem_to_hbm [thread:$0]  (%p1012_p4), %s944_s21, 2048, %s941_s19, %s948_s23, %s718_s29, %s719_s9, %s720_s10  }
  0x7d PF: > { %s390_s22 = sand.u32 1, %s681_s11   ;;  %p1013_p1 = scmp.ne.s32.totalorder %s1008_s27, 0 }
  0x7e   : > { %p1014_p5 = scmp.ge.s32.totalorder %s709_s18, 2  ;;  %s391_s14 = scalar_lea.sflag [#allocation5], %s390_s22 }
  0x80   : > { %p491_p8 = pnand %p1014_p5, %p1013_p1 }
  0x82   : > { %675 = dma.done.wait (!%p491_p8), %s391_s14, 2048  }
  0x83   : > { %677 = vsyncadd (!%p491_p8), %s391_s14, 4294965248  ;;  %s19_s18 = sadd.s32 1, %s709_s18   ;;  %s1015_s11 = smov %s685_s12 }
  0x84   : > { %p16_p13 = scmp.ge.s32.totalorder %s19_s18, 4   ;;  %s1016_s12 = smov %s689_s13 }
  0x85   : > { %s1017_s13 = smov %s797_s25  ;;  %s1018_s14 = smov %s697_s15 }
  0x86   : > { %s990_s15 = smov 0   ;;  %s1019_s16 = smov %s705_s17 }
  0x87   : > { %s1020_s17 = smov %s1022_s20  ;;  %18 = sbr.rel (!%p16_p13) target bundleno = 9 (0x9), region = 85 }
  0x8e   :  { %396 = vsyncpa [#allocation4], 1 }
  0x8f   :  { %398 = vsyncpa [#allocation4 + $0x1], 1 }
  0x90   :  { %399 = vsyncpa [#allocation5], 1 }
  0x91   :  { %401 = vsyncpa [#allocation5 + $0x1], 1 }

</bundles_post_ra>
